<compile_context>
chip_gen: v7x
topology: tpu7x:2x2x1
jax: 0.10.0
libtpu: 0.0.40
codegen_flags: <defaults>
</compile_context>

<pallas_src>
import math
import jax
import jax.numpy as jnp
from jax import lax
from jax.experimental import pallas as pl
from jax.experimental.pallas import tpu as pltpu

_EPS = 1e-12  # F.normalize default eps (clamp_min on the norm)


def _round_up(v, m):
    return ((v + m - 1) // m) * m


def _cosine_linear_kernel(x_ref, w_ref, xs_ref, ws_ref, o_ref):
    # Raw logits on the MXU: contract the last (lane) dim of both operands
    # (x @ W^T) without materializing a transposed W; accumulate in f32.
    dot = lax.dot_general(
        x_ref[...], w_ref[...],
        dimension_numbers=(((1,), (1,)), ((), ())),
        preferred_element_type=jnp.float32)          # (TB, TO) f32
    # Normalization + sigma folded into two cheap broadcast post-scales:
    #   xs = 1 / max(||x_row||, eps)          (TB, 1)
    #   ws = sigma / max(||w_row||, eps)      (1, TO)
    o_ref[...] = (dot * xs_ref[...] * ws_ref[...]).astype(o_ref.dtype)


def _vmem_capacity_bytes():
    try:
        info = pltpu.get_tpu_info()
        for attr in ("vmem_capacity_bytes", "vmem_bytes", "vmem_size_bytes"):
            v = getattr(info, attr, None)
            if v:
                return int(v)
    except Exception:
        pass
    return 64 * 1024 * 1024  # conservative fallback (v7x per-TC VMEM)


def cosine_linear(x, weight, sigma):
    """Pallas implementation of CosineLinear.forward (use_RP=False).

    Args:
      x:      (batch, in_features) float array
      weight: (out_features, in_features) float array
      sigma:  scalar float (any shape with one element)
    Returns:
      dict with 'logits' of shape (batch, out_features), dtype of x.
    """
    B, D = x.shape
    O, D2 = weight.shape
    assert D == D2
    out_dtype = x.dtype
    x_isz = x.dtype.itemsize
    w_isz = weight.dtype.itemsize
    o_isz = jnp.dtype(out_dtype).itemsize

    # --- hoisted normalization scales (one fused XLA reduce each) ----------
    sigma_f = jnp.asarray(sigma, jnp.float32).reshape(())
    xf = x.astype(jnp.float32)
    x_scale = lax.rsqrt(jnp.maximum(jnp.sum(xf * xf, axis=1, keepdims=True),
                                    _EPS * _EPS))                       # (B, 1)
    wf = weight.astype(jnp.float32)
    w_scale = (sigma_f * lax.rsqrt(
        jnp.maximum(jnp.sum(wf * wf, axis=1), _EPS * _EPS)))[None, :]   # (1, O)

    # --- tile selection: lane/sublane aligned, generation-aware VMEM budget -
    sub = max(8, 32 // x_isz)            # sublane quantum: 8 f32, 16 bf16, 32 i8
    D_pad = _round_up(D, 128)

    vmem = _vmem_capacity_bytes()
    budget = max(24 << 20, int(vmem * 0.7) - (8 << 20))
    vmem_limit = int(min(vmem, budget + (16 << 20)))

    TB = min(_round_up(B, sub), 256)
    TO = min(_round_up(O, 128), 2048)

    def _bytes(tb, to):
        # double-buffered x / W / out tiles (each in its own dtype), the f32
        # (tb,to) dot + scaled temporaries, and the streamed scale vectors.
        return (2 * tb * D_pad * x_isz
                + 2 * to * D_pad * w_isz
                + 2 * tb * to * o_isz
                + 2 * tb * to * 4
                + 2 * (tb + to) * 4)

    while _bytes(TB, TO) > budget:
        if TB > 128:
            TB = max(128, _round_up(TB // 2, sub))
        elif TO > 128:
            TO = max(128, _round_up(TO // 2, 128))
        elif TB > sub:
            TB = max(sub, _round_up(TB // 2, sub))
        else:
            break

    B_pad = _round_up(B, TB)
    O_pad = _round_up(O, TO)

    # --- zero-pad to tile boundaries (zeros are inert for the dot) ---------
    x_p = x if (B_pad, D_pad) == (B, D) else jnp.pad(x, ((0, B_pad - B), (0, D_pad - D)))
    w_p = weight if (O_pad, D_pad) == (O, D) else jnp.pad(weight, ((0, O_pad - O), (0, D_pad - D)))
    xs_p = x_scale if B_pad == B else jnp.pad(x_scale, ((0, B_pad - B), (0, 0)))
    ws_p = w_scale if O_pad == O else jnp.pad(w_scale, ((0, 0), (0, O_pad - O)))

    n_b = B_pad // TB
    n_o = O_pad // TO

    # --- resident operand = the larger one; the smaller streams per step ---
    if O_pad * w_isz >= B_pad * x_isz:
        # W tile stays VMEM-resident across the inner (batch-tile) axis.
        grid = (n_o, n_b)
        x_map = lambda j, i: (i, 0)
        w_map = lambda j, i: (j, 0)
        xs_map = lambda j, i: (i, 0)
        ws_map = lambda j, i: (0, j)
        o_map = lambda j, i: (i, j)
    else:
        # x tile stays VMEM-resident across the inner (weight-tile) axis.
        grid = (n_b, n_o)
        x_map = lambda i, j: (i, 0)
        w_map = lambda i, j: (j, 0)
        xs_map = lambda i, j: (i, 0)
        ws_map = lambda i, j: (0, j)
        o_map = lambda i, j: (i, j)

    logits_p = pl.pallas_call(
        _cosine_linear_kernel,
        out_shape=jax.ShapeDtypeStruct((B_pad, O_pad), out_dtype),
        grid=grid,
        in_specs=[
            pl.BlockSpec((TB, D_pad), x_map),     # x tile
            pl.BlockSpec((TO, D_pad), w_map),     # W tile
            pl.BlockSpec((TB, 1), xs_map),        # x inverse-norms (f32)
            pl.BlockSpec((1, TO), ws_map),        # sigma * W inverse-norms (f32)
        ],
        out_specs=pl.BlockSpec((TB, TO), o_map),
        compiler_params=pltpu.CompilerParams(
            dimension_semantics=("parallel", "parallel"),
            vmem_limit_bytes=vmem_limit),
    )(x_p, w_p, xs_p, ws_p)

    return {"logits": logits_p[:B, :O]}


def _reference(x, weight, sigma):
    """Plain-JAX reference with PyTorch F.normalize semantics (in f32)."""
    xf = x.astype(jnp.float32)
    wf = weight.astype(jnp.float32)
    xn = xf / jnp.maximum(jnp.linalg.norm(xf, axis=1, keepdims=True), _EPS)
    wn = wf / jnp.maximum(jnp.linalg.norm(wf, axis=1, keepdims=True), _EPS)
    return jnp.asarray(sigma, jnp.float32).reshape(()) * (xn @ wn.T)


def _check(x, weight, sigma, atol, rtol):
    out = cosine_linear(x, weight, sigma)
    logits = jax.block_until_ready(out["logits"])
    assert logits.shape == (x.shape[0], weight.shape[0])
    assert logits.dtype == x.dtype
    ref = _reference(x, weight, sigma)
    err = float(jnp.max(jnp.abs(logits.astype(jnp.float32) - ref)))
    assert jnp.allclose(logits.astype(jnp.float32), ref, atol=atol, rtol=rtol), err


if __name__ == "__main__":
    key = jax.random.PRNGKey(0)
    k1, k2, k3, k4, k5, k6 = jax.random.split(key, 6)

    # --- Test 1: module-default small shapes (batch=8, in=32, out=16) ------
    batch, in_features, out_features = 8, 32, 16
    stdv = 1.0 / math.sqrt(in_features)
    weight = jax.random.uniform(k1, (out_features, in_features), jnp.float32,
                                minval=-stdv, maxval=stdv)
    sigma = jnp.ones((1,), jnp.float32)  # reset_parameters(): sigma = 1
    x = jax.random.normal(k2, (batch, in_features), jnp.float32)
    _check(x, weight, sigma, atol=1e-4, rtol=1e-4)

    # --- Test 2: multi-tile grid + padding, W-resident branch (O >= B) -----
    B2, D2, O2 = 272, 200, 640
    stdv2 = 1.0 / math.sqrt(D2)
    w2 = jax.random.uniform(k3, (O2, D2), jnp.float32, minval=-stdv2, maxval=stdv2)
    x2 = jax.random.normal(k4, (B2, D2), jnp.float32)
    _check(x2, w2, jnp.full((1,), 1.5, jnp.float32), atol=1e-4, rtol=1e-4)

    # --- Test 3: x-resident branch (batch bytes > weight bytes) ------------
    B3, D3, O3 = 400, 160, 96
    stdv3 = 1.0 / math.sqrt(D3)
    w3 = jax.random.uniform(k5, (O3, D3), jnp.float32, minval=-stdv3, maxval=stdv3)
    x3 = jax.random.normal(k6, (B3, D3), jnp.float32)
    _check(x3, w3, jnp.full((1,), 0.5, jnp.float32), atol=1e-4, rtol=1e-4)

    # --- Test 4: bf16 operands fed natively to the MXU (f32 accumulate) ----
    _check(x.astype(jnp.bfloat16), weight.astype(jnp.bfloat16), sigma,
           atol=2e-2, rtol=2e-2)

    # TODO(synk): use_RP=True branch (ReLU(x @ W_rand) @ W.T) not implemented —
    # W_rand is None at __init__, so that path is dead code in the spec.

    print("KERNEL_OK")
</pallas_src>

<mosaic_0001>
module attributes {stable_mosaic.version = 11 : i64} {
  func.func @_cosine_linear_kernel(%arg0: i32, %arg1: i32, %arg2: memref<8x128xf32, #tpu.memory_space<vmem>>, %arg3: memref<128x128xf32, #tpu.memory_space<vmem>>, %arg4: memref<8x1xf32, #tpu.memory_space<vmem>>, %arg5: memref<1x128xf32, #tpu.memory_space<vmem>>, %arg6: memref<8x128xf32, #tpu.memory_space<vmem>>) attributes {dimension_semantics = [#tpu.dimension_semantics<parallel>, #tpu.dimension_semantics<parallel>], iteration_bounds = array<i64: 1, 1>, scalar_prefetch = 0 : i64, scratch_operands = 0 : i64, tpu.core_type = #tpu.core_type<tc>, window_params = [{transform_indices = @transform_0, window_bounds = array<i64: 8, 128>}, {transform_indices = @transform_1, window_bounds = array<i64: 128, 128>}, {transform_indices = @transform_2, window_bounds = array<i64: 8, 1>}, {transform_indices = @transform_3, window_bounds = array<i64: 1, 128>}, {transform_indices = @transform_4, window_bounds = array<i64: 8, 128>}]} {
    %c0 = arith.constant 0 : index
    %c0_0 = arith.constant 0 : index
    %0 = vector.load %arg2[%c0, %c0_0] : memref<8x128xf32, #tpu.memory_space<vmem>>, vector<8x128xf32>
    %c0_1 = arith.constant 0 : index
    %c0_2 = arith.constant 0 : index
    %1 = vector.load %arg3[%c0_1, %c0_2] : memref<128x128xf32, #tpu.memory_space<vmem>>, vector<128x128xf32>
    %cst = arith.constant dense<0.000000e+00> : vector<8x128xf32>
    %2 = tpu.matmul %0, %1, %cst {dimension_numbers = #tpu.dot_dimension_numbers<[1], [1], [0], [0], [0, 0, 1, 0], [], []>} : vector<8x128xf32>, vector<128x128xf32>, vector<8x128xf32> -> vector<8x128xf32>
    %c0_3 = arith.constant 0 : index
    %c0_4 = arith.constant 0 : index
    %3 = vector.load %arg4[%c0_3, %c0_4] : memref<8x1xf32, #tpu.memory_space<vmem>>, vector<8x1xf32>
    %4 = vector.broadcast %3 : vector<8x1xf32> to vector<8x128xf32>
    %5 = arith.mulf %2, %4 : vector<8x128xf32>
    %c0_5 = arith.constant 0 : index
    %c0_6 = arith.constant 0 : index
    %6 = vector.load %arg5[%c0_5, %c0_6] : memref<1x128xf32, #tpu.memory_space<vmem>>, vector<1x128xf32>
    %7 = vector.broadcast %6 : vector<1x128xf32> to vector<8x128xf32>
    %8 = arith.mulf %5, %7 : vector<8x128xf32>
    %c0_7 = arith.constant 0 : index
    %c0_8 = arith.constant 0 : index
    %9 = vector.load %arg6[%c0_7, %c0_8] : memref<8x128xf32, #tpu.memory_space<vmem>>, vector<8x128xf32>
    tpu.vector_store %arg6[%c0_7, %c0_8], %8 {strides = array<i32>} : memref<8x128xf32, #tpu.memory_space<vmem>>, vector<8x128xf32>,
    return
  }
  func.func @transform_0(%arg0: i32, %arg1: i32) -> (i32, i32) {
    %c0_i32 = arith.constant 0 : i32
    %c0_i32_0 = arith.constant 0 : i32
    return %arg1, %c0_i32 : i32, i32
  }
  func.func @transform_1(%arg0: i32, %arg1: i32) -> (i32, i32) {
    %c0_i32 = arith.constant 0 : i32
    %c0_i32_0 = arith.constant 0 : i32
    return %arg0, %c0_i32 : i32, i32
  }
  func.func @transform_2(%arg0: i32, %arg1: i32) -> (i32, i32) {
    %c0_i32 = arith.constant 0 : i32
    %c0_i32_0 = arith.constant 0 : i32
    return %arg1, %c0_i32 : i32, i32
  }
  func.func @transform_3(%arg0: i32, %arg1: i32) -> (i32, i32) {
    %c0_i32 = arith.constant 0 : i32
    %c0_i32_0 = arith.constant 0 : i32
    return %c0_i32, %arg0 : i32, i32
  }
  func.func @transform_4(%arg0: i32, %arg1: i32) -> (i32, i32) {
    %c0_i32 = arith.constant 0 : i32
    return %arg1, %arg0 : i32, i32
  }
}

</mosaic_0001>

<bundles_post_ra>
// kernel: tpu_custom_call.1
= control target key start
LH: loop header
LB: loop body
LE: loop exit
PB: predicated region body
PF: predicated region fallthrough
CT: control target
= control target key end

     0   :  { %9 = vsyncpa [#allocation3], 0  ;;  %s350_s0 = inlined_call_operand.vmem [shape: f32[8,128], index: 0, kind: input, shape index: {}]   ;;  %s351_s1 = inlined_call_operand.hbm [shape: f32[128,128], index: 1, kind: input, shape index: {}]   ;;  %s352_s2 = inlined_call_operand.vmem [shape: f32[8,1], index: 2, kind: input, shape index: {}]   ;;  %s353_s3 = inlined_call_operand.vmem [shape: f32[1,128], index: 3, kind: input, shape index: {}]   ;;  %s354_s4 = inlined_call_operand.hbm [shape: f32[8,128], index: 4, kind: output, shape index: {}]  }
   0x1   :  { %10 = vsyncpa [#allocation4], 0  ;;  %s284_s15 = smov [#allocation2]   ;;  %s236_s19 = scalar_lea.hbm %s351_s1, 2048 }
   0x2   :  { %s18_s16 = sshll.u32 %s284_s15, 4  ;;  %p237_p0 = scmp.ne.s32.totalorder %s351_s1, %s236_s19  ;;  %s19_s16 = int_to_ptr.vmem [resolvable:$true] %s18_s16 }
   0x3   :  { %p240_p1 = scmp.lt.u32.totalorder %s236_s19, %s351_s1 }
   0x5   :  { %p242_p2 = pnand %p240_p1, %p237_p0 }
   0x7   :  { %245 = shalt.err (!%p242_p2)
}
   0x8   :  { %s246_s24 = scalar_lea.vmem %s19_s16, 2048  ;;  %p251_p4 = scmp.lt.s32.totalorder %s19_s16, %s19_s16 }
   0x9   :  { %p247_p3 = scmp.ne.s32.totalorder %s19_s16, %s246_s24  ;;  %p252_p5 = scmp.lt.s32.totalorder %s246_s24, %s246_s24 }
   0xb   :  { %p253_p6 = por %p252_p5, %p251_p4 }
   0xd   :  { %p254_p7 = pnand %p253_p6, %p247_p3 }
   0xf   :  { %257 = shalt.err (!%p254_p7)
}
  0x10   :  { %s285_s25 = smov 128   ;;  %s286_s26 = smov 8  }
  0x11   :  { %24 = dma.hbm_to_vmem [thread:$0]  %s351_s1, 2048, %s19_s16, [#allocation3], %s285_s25, %s285_s25, %s286_s26  }
  0x12   :  { %280 = dma.done.wait [#allocation3], 2048  }
  0x13   :  { %281 = vsyncadd [#allocation3], 4294965248  ;;  %v287_v0 = vmov 0.0|0.0   ;;  %vm288_vm0 = vmmov 0   ;;  %v289_v1 = vmov 0.0   ;;  %v290_v2 = vmov 0  }
  0x14   :  { %203 = vmatprep.subr.bf16.mxu0 %v287_v0  ;;  %200 = vmatprep.mubr.msk.f32.mxu0 %vm288_vm0, %v289_v1  ;;  %v33_v3 = vld [vmem:[#allocation2] sm:$0xff]  ;;  %v34_v4 = vld [vmem:[#allocation2 + $0x8] sm:$0xff]  ;;  %v35_v6 = vld [vmem:[#allocation2 + $0x10] sm:$0xff]  ;;  %s291_s7 = smov [#allocation5]  }
  0x15   :  { %235 = vset.pattern.permute.xlu0 %v290_v2  ;;  %v204_v5 = vpack.c.bf16 %v34_v4, %v33_v3  ;;  %v36_v7 = vld [vmem:[#allocation2 + $0x18] sm:$0xff]  ;;  %v119_v8 = vld [vmem:[%s352_s2] sm:$0xff]  ;;  %v38_v11 = vld [vmem:[#allocation2 + $0x28] sm:$0xff]  ;;  %s141_s8 = sshll.u32 %s291_s7, 4  ;;  %s142_s8 = int_to_ptr.vmem [resolvable:$true] %s141_s8 }
  0x16   :  { %122 = vperm.xlu0 %235, %v119_v8   ;;  %v207_v9 = vpack.c.bf16 %v36_v7, %v35_v6  ;;  %v37_v10 = vld [vmem:[#allocation2 + $0x20] sm:$0xff]  ;;  %v39_v13 = vld [vmem:[#allocation2 + $0x30] sm:$0xff]  ;;  %v40_v14 = vld [vmem:[#allocation2 + $0x38] sm:$0xff]  ;;  %s258_s9 = scalar_lea.vmem %s142_s8, 128  ;;  %p263_p9 = scmp.lt.s32.totalorder %s142_s8, %s142_s8 }
  0x17   :  { %205 = vmatpush3.bf16.xpose.msra.mxu0 %v204_v5  ;;  %v210_v12 = vpack.c.bf16 %v38_v11, %v37_v10  ;;  %v213_v15 = vpack.c.bf16 %v40_v14, %v39_v13  ;;  %v41_v16 = vld [vmem:[#allocation2 + $0x40] sm:$0xff]  ;;  %v42_v17 = vld [vmem:[#allocation2 + $0x48] sm:$0xff]  ;;  %v43_v19 = vld [vmem:[#allocation2 + $0x50] sm:$0xff]  ;;  %p259_p8 = scmp.ne.s32.totalorder %s142_s8, %s258_s9  ;;  %p264_p10 = scmp.lt.s32.totalorder %s258_s9, %s258_s9 }
  0x18   :  { %206 = vmatprep.subr.bf16.mxu0 %v287_v0  ;;  %v216_v18 = vpack.c.bf16 %v42_v17, %v41_v16  ;;  %v44_v20 = vld [vmem:[#allocation2 + $0x58] sm:$0xff]  ;;  %v45_v22 = vld [vmem:[#allocation2 + $0x60] sm:$0xff]  ;;  %v46_v23 = vld [vmem:[#allocation2 + $0x68] sm:$0xff] }
  0x19   :  { %v219_v21 = vpack.c.bf16 %v44_v20, %v43_v19  ;;  %v222_v24 = vpack.c.bf16 %v46_v23, %v45_v22  ;;  %v47_v25 = vld [vmem:[#allocation2 + $0x70] sm:$0xff]  ;;  %v48_v26 = vld [vmem:[#allocation2 + $0x78] sm:$0xff]  ;;  %v32_v28 = vld [vmem:[%s350_s0] sm:$0xff]  ;;  %p265_p11 = por %p264_p10, %p263_p9 }
  0x1a   :  { %v225_v27 = vpack.c.bf16 %v48_v26, %v47_v25  ;;  %v150_v31 = vld [vmem:[%s353_s3] ss:$0 sm:$0xff] }
  0x1b   :  { %p266_p12 = pnand %p265_p11, %p259_p8 }
  0x1f   :  { %208 = vmatpush3.bf16.xpose.msra.mxu0 %v207_v9 }
  0x20   :  { %209 = vmatprep.subr.bf16.mxu0 %v287_v0 }
  0x27   :  { %211 = vmatpush3.bf16.xpose.msra.mxu0 %v210_v12 }
  0x28   :  { %212 = vmatprep.subr.bf16.mxu0 %v287_v0 }
  0x2f   :  { %214 = vmatpush3.bf16.xpose.msra.mxu0 %v213_v15 }
  0x30   :  { %215 = vmatprep.subr.bf16.mxu0 %v287_v0 }
  0x37   :  { %217 = vmatpush3.bf16.xpose.msra.mxu0 %v216_v18 }
  0x38   :  { %218 = vmatprep.subr.bf16.mxu0 %v287_v0 }
  0x3f   :  { %220 = vmatpush3.bf16.xpose.msra.mxu0 %v219_v21 }
  0x40   :  { %221 = vmatprep.subr.bf16.mxu0 %v287_v0 }
  0x47   :  { %223 = vmatpush3.bf16.xpose.msra.mxu0 %v222_v24 }
  0x48   :  { %224 = vmatprep.subr.bf16.mxu0 %v287_v0 }
  0x4f   :  { %226 = vmatpush3.bf16.xpose.msra.mxu0 %v225_v27 }
  0x56   :  { %201 = vmatmul.mubr.f32.vlgmr.msra.gmra.mrb[0].mxu0 %v32_v28 }
  0x95   :  { %v123_v29 = vpop.permute.xlu0 %122 }
 0x129   :  { %v115_v30 = vpop.f32.mrb[0].mxu0 }
 0x12a   :  { %v125_v32 = vmul.f32 %v123_v29, %v115_v30  ;;  %v202_v33 = vpop.f32.mrb[1].mxu0 }
 0x12c   :  { %v133_v34 = vmul.f32 %v150_v31, %v125_v32 }
 0x12e   :  { %134 = vst [vmem:[#allocation5] sm:$0xff] %v133_v34 }
 0x12f   :  { %269 = shalt.err (!%p266_p12)
}
 0x130   :  { %s270_s11 = scalar_lea.hbm %s354_s4, 128 }
 0x131   :  { %p271_p13 = scmp.ne.s32.totalorder %s354_s4, %s270_s11  ;;  %p274_p0 = scmp.lt.u32.totalorder %s270_s11, %s354_s4 }
 0x133   :  { %p276_p1 = pnand %p274_p0, %p271_p13 }
 0x135   :  { %279 = shalt.err (!%p276_p1)
}
 0x136   :  { %144 = dma.vmem_to_hbm [thread:$0]  %s142_s8, 128, %s354_s4, [#allocation4]  }
 0x137   :  { %282 = dma.done.wait [#allocation4], 128  }
 0x138   :  { %283 = vsyncadd [#allocation4], 4294967168 }
 0x139   :  { %148 = vsyncpa [#allocation3], 1 }
 0x13a   :  { %149 = vsyncpa [#allocation4], 1 }

</bundles_post_ra>
